<compile_context>
chip_gen: v7x
topology: tpu7x:2x2x1
jax: 0.10.0
libtpu: 0.0.40
codegen_flags: <defaults>
</compile_context>

<pallas_src>
import functools
import math

import jax
import jax.numpy as jnp
from jax.experimental import pallas as pl
from jax.experimental.pallas import tpu as pltpu

IGNORE_INDEX = 255


def _ohem_ce_kernel(logits_ref, labels_ref, loss_ref, sum_ref, cnt_ref, *,
                    ignore_index, thresh, n_pixels, bf16_exp):
    """Per-pixel CE + fused OHEM ">thresh" partial reductions for one tile.

    logits_ref: (C, TP)   native dtype (f32/bf16), pixels on lanes
    labels_ref: (1, TP)   int32
    loss_ref  : (1, TP)   f32  per-pixel loss (0 for ignored / out-of-bounds)
    sum_ref   : (8, 128)  f32  tile-wide sum of losses  > thresh (broadcast)
    cnt_ref   : (8, 128)  i32  tile-wide count of losses > thresh (broadcast)
    """
    tp = labels_ref.shape[-1]
    x = logits_ref[...].astype(jnp.float32)                  # (C, TP) f32 compute
    lbl = labels_ref[...]                                     # (1, TP)

    # Numerically stable logsumexp over the class (sublane) axis.
    m = jnp.max(x, axis=0, keepdims=True)                     # (1, TP)
    centered = x - m
    if bf16_exp:
        # v6e/v7x: EUP handles bf16 -> ~2x transcendental throughput.
        e = jnp.exp(centered.astype(jnp.bfloat16)).astype(jnp.float32)
    else:
        e = jnp.exp(centered)
    lse = m + jnp.log(jnp.sum(e, axis=0, keepdims=True))      # (1, TP)

    # Gather the target-class logit via compare+select+sum (no dynamic gather).
    cls = jax.lax.broadcasted_iota(jnp.int32, x.shape, 0)      # (C, TP) class ids
    picked = jnp.sum(jnp.where(cls == lbl, x, 0.0), axis=0, keepdims=True)

    # Bound mask: the last pixel tile may overrun P (no wrapper-side padding);
    # those lanes contain garbage and must not contribute anywhere.
    pix = (pl.program_id(1) * tp
           + jax.lax.broadcasted_iota(jnp.int32, lbl.shape, 1))  # (1, TP)
    in_bounds = pix < n_pixels
    valid = (lbl != ignore_index) & in_bounds

    loss = jnp.where(valid, lse - picked, 0.0)                 # (1, TP) f32
    loss_ref[...] = loss.astype(loss_ref.dtype)

    # Fused OHEM statistics: sum / count of per-pixel losses > thresh.
    # Ignored pixels carry loss 0 (they stay in the ranking, like torch).
    sel = in_bounds & (loss > thresh)
    sum_ref[...] = jnp.full(sum_ref.shape, jnp.sum(jnp.where(sel, loss, 0.0)),
                            dtype=sum_ref.dtype)
    cnt_ref[...] = jnp.full(cnt_ref.shape, jnp.sum(sel.astype(jnp.int32)),
                            dtype=cnt_ref.dtype)


def _supports_bf16_eup():
    """bf16 transcendentals are a win on v6e/v7x; keep f32 exp on v5e/older."""
    try:
        kind = jax.devices()[0].device_kind.lower()
    except Exception:
        return False
    return ("v6" in kind) or ("v7" in kind)


def per_pixel_ce_with_stats(logits_nchw, labels_nhw, thresh,
                            ignore_index=IGNORE_INDEX, tile_p=32768,
                            bf16_exp=None):
    """Per-pixel CE (reduction='none') + fused sum/count of losses > thresh.

    Returns (loss_flat: (N*H*W,) f32, sum_gt: f32 scalar, cnt_gt: i32 scalar).
    """
    if bf16_exp is None:
        bf16_exp = _supports_bf16_eup()

    N, C, H, W = logits_nchw.shape
    P = H * W

    # Free reshapes only (merge trailing contiguous dims) -- no transpose, no
    # upcast, and no jnp.pad copies of the logits stream in HBM.
    logits3d = logits_nchw.reshape(N, C, P)
    labels3d = labels_nhw.reshape(N, 1, P).astype(jnp.int32)

    # --- tile size selection -------------------------------------------------
    # Keep the double-buffered logits blocks comfortably inside scoped VMEM.
    bytes_per_pixel = C * logits3d.dtype.itemsize
    tile_p = min(tile_p, max(128, (24 * 1024 * 1024) // (2 * bytes_per_pixel)))
    if N == 1 and P >= 256:
        # v7x megacore: keep >=2 tiles on a parallel axis when batch == 1.
        tile_p = min(tile_p, -(-P // 2))          # ceil(P / 2)
    if tile_p < P:
        tile_p = max(128, (tile_p // 128) * 128)  # lane-aligned partial blocks
    if tile_p >= P:
        tile_p = P                                # full-extent block

    n_tiles = pl.cdiv(P, tile_p)
    grid = (N, n_tiles)

    kernel = functools.partial(_ohem_ce_kernel, ignore_index=int(ignore_index),
                               thresh=float(thresh), n_pixels=P,
                               bf16_exp=bool(bf16_exp))

    loss, psum, pcnt = pl.pallas_call(
        kernel,
        out_shape=(
            jax.ShapeDtypeStruct((N, 1, P), jnp.float32),
            jax.ShapeDtypeStruct((N, n_tiles, 8, 128), jnp.float32),
            jax.ShapeDtypeStruct((N, n_tiles, 8, 128), jnp.int32),
        ),
        grid=grid,
        in_specs=[
            # N squeezed; kernel sees (C, tile_p) with pixels on lanes.
            pl.BlockSpec((None, C, tile_p), lambda n, p: (n, 0, p)),
            pl.BlockSpec((None, 1, tile_p), lambda n, p: (n, 0, p)),
        ],
        out_specs=(
            pl.BlockSpec((None, 1, tile_p), lambda n, p: (n, 0, p)),
            pl.BlockSpec((None, None, 8, 128), lambda n, p: (n, p, 0, 0)),
            pl.BlockSpec((None, None, 8, 128), lambda n, p: (n, p, 0, 0)),
        ),
        compiler_params=pltpu.CompilerParams(
            dimension_semantics=("parallel", "parallel")),
    )(logits3d, labels3d)

    sum_gt = jnp.sum(psum[:, :, 0, 0])
    cnt_gt = jnp.sum(pcnt[:, :, 0, 0])
    return loss.reshape(-1), sum_gt, cnt_gt


def ohem_ce_loss(logits_nchw, labels_nhw, thresh_prob, n_min,
                 ignore_index=IGNORE_INDEX, bf16_exp=None):
    """OHEM cross-entropy; matches PyTorch OhemCELoss.forward (weight=None).

    Ignored pixels contribute loss 0 and stay in the ranking, exactly like
    nn.CrossEntropyLoss(ignore_index=..., reduction='none').
    """
    # TODO(synk): the optional per-class `weight` tensor of CrossEntropyLoss is
    # not implemented (matches the module's weight=None default).
    thresh = -math.log(float(thresh_prob))

    loss, sum_gt, cnt_gt = per_pixel_ce_with_stats(
        logits_nchw, labels_nhw, thresh, ignore_index=ignore_index,
        bf16_exp=bf16_exp)

    P_total = loss.shape[0]
    if not (1 <= n_min < P_total):
        # n_min == 0 would make torch.mean(loss[:0]) NaN as well; require >= 1.
        raise ValueError(f"n_min={n_min} must be in [1, {P_total})")

    # sorted_desc[n_min] > thresh  <=>  count(loss > thresh) > n_min, so the
    # fused count doubles as the branch predicate; the expensive top_k only
    # executes inside the branch that actually needs it.
    mean_gt_thresh = sum_gt / jnp.maximum(cnt_gt.astype(jnp.float32), 1.0)
    return jax.lax.cond(
        cnt_gt > n_min,
        lambda _: mean_gt_thresh,
        lambda l: jnp.mean(jax.lax.top_k(l, n_min)[0]),
        loss)


def _ref_ohem(logits, labels, thresh_prob, n_min, ignore_index=IGNORE_INDEX):
    """Pure-JAX reference of the PyTorch forward (for correctness check)."""
    N, C, H, W = logits.shape
    x = jnp.transpose(logits, (0, 2, 3, 1)).reshape(-1, C).astype(jnp.float32)
    y = labels.reshape(-1)
    logp = jax.nn.log_softmax(x, axis=-1)
    nll = -jnp.take_along_axis(logp, jnp.clip(y, 0, C - 1)[:, None], axis=-1)[:, 0]
    loss = jnp.where(y == ignore_index, 0.0, nll)
    thresh = -jnp.log(jnp.float32(thresh_prob))
    srt = jnp.sort(loss)[::-1]
    kth = srt[n_min]
    mask = loss > thresh
    mean_gt = jnp.sum(jnp.where(mask, loss, 0.0)) / jnp.maximum(jnp.sum(mask), 1)
    mean_top = jnp.mean(srt[:n_min])
    return jnp.where(kth > thresh, mean_gt, mean_top)


if __name__ == "__main__":
    key = jax.random.PRNGKey(0)
    k1, k2, k3, k4, k5 = jax.random.split(key, 5)

    # --- Test 1: small NCHW batch, ignore pixels, f32 logits, exact check ----
    N, C, H, W = 2, 4, 16, 16
    logits = jax.random.normal(k1, (N, C, H, W), dtype=jnp.float32)
    labels = jax.random.randint(k2, (N, H, W), 0, C, dtype=jnp.int32)
    ignore_mask = jax.random.bernoulli(k3, p=0.1, shape=(N, H, W))
    labels = jnp.where(ignore_mask, jnp.int32(IGNORE_INDEX), labels)
    thresh_prob = 0.7
    n_min = (N * H * W) // 16          # 32

    out = jax.block_until_ready(
        ohem_ce_loss(logits, labels, thresh_prob, n_min, bf16_exp=False))
    ref = jax.block_until_ready(_ref_ohem(logits, labels, thresh_prob, n_min))
    assert out.shape == () and jnp.isfinite(out)
    assert jnp.abs(out - ref) < 1e-4, (out, ref)

    # --- Test 2: batch 1, pixel count not tile-divisible (bound-mask path) ---
    # Exercises the unpadded overrunning last block, the N==1 tile split for
    # v7x megacore, and (with a high threshold) the top_k branch of the cond.
    N2, C2, H2, W2 = 1, 5, 10, 33      # P = 330, tiles of 128 -> last is ragged
    logits2 = 0.3 * jax.random.normal(k4, (N2, C2, H2, W2), dtype=jnp.float32)
    labels2 = jax.random.randint(k5, (N2, H2, W2), 0, C2, dtype=jnp.int32)
    n_min2 = 20
    for tp in (0.7, 0.05):             # 0.05 -> large thresh -> top_k branch
        out2 = jax.block_until_ready(
            ohem_ce_loss(logits2, labels2, tp, n_min2, bf16_exp=False))
        ref2 = jax.block_until_ready(_ref_ohem(logits2, labels2, tp, n_min2))
        assert jnp.isfinite(out2) and jnp.abs(out2 - ref2) < 1e-4, (tp, out2, ref2)

    # --- Test 3: bf16 logits stream + bf16 exponentials (v6e/v7x option) -----
    logits_bf16 = logits.astype(jnp.bfloat16)
    out3 = jax.block_until_ready(
        ohem_ce_loss(logits_bf16, labels, thresh_prob, n_min, bf16_exp=True))
    ref3 = jax.block_until_ready(
        _ref_ohem(logits_bf16.astype(jnp.float32), labels, thresh_prob, n_min))
    assert jnp.isfinite(out3) and jnp.abs(out3 - ref3) < 5e-2, (out3, ref3)

    print("KERNEL_OK")
</pallas_src>

<mosaic_0001>
module attributes {stable_mosaic.version = 11 : i64} {
  func.func @_ohem_ce_kernel(%arg0: i32, %arg1: i32, %arg2: memref<1x4x256xf32, #tpu.memory_space<vmem>>, %arg3: memref<1x1x256xi32, #tpu.memory_space<vmem>>, %arg4: memref<1x1x256xf32, #tpu.memory_space<vmem>>, %arg5: memref<1x1x8x128xf32, #tpu.memory_space<vmem>>, %arg6: memref<1x1x8x128xi32, #tpu.memory_space<vmem>>) attributes {dimension_semantics = [#tpu.dimension_semantics<parallel>, #tpu.dimension_semantics<parallel>], iteration_bounds = array<i64: 2, 1>, scalar_prefetch = 0 : i64, scratch_operands = 0 : i64, tpu.core_type = #tpu.core_type<tc>, window_params = [{transform_indices = @transform_0, window_bounds = array<i64: 1, 4, 256>}, {transform_indices = @transform_1, window_bounds = array<i64: 1, 1, 256>}, {transform_indices = @transform_2, window_bounds = array<i64: 1, 1, 256>}, {transform_indices = @transform_3, window_bounds = array<i64: 1, 1, 8, 128>}, {transform_indices = @transform_4, window_bounds = array<i64: 1, 1, 8, 128>}]} {
    %c0 = arith.constant 0 : index
    %c0_0 = arith.constant 0 : index
    %c0_1 = arith.constant 0 : index
    %0 = vector.load %arg2[%c0, %c0_0, %c0_1] : memref<1x4x256xf32, #tpu.memory_space<vmem>>, vector<1x4x256xf32>
    %1 = vector.shape_cast %0 : vector<1x4x256xf32> to vector<4x256xf32>
    %c0_2 = arith.constant 0 : index
    %c0_3 = arith.constant 0 : index
    %c0_4 = arith.constant 0 : index
    %2 = vector.load %arg3[%c0_2, %c0_3, %c0_4] : memref<1x1x256xi32, #tpu.memory_space<vmem>>, vector<1x1x256xi32>
    %3 = vector.shape_cast %2 : vector<1x1x256xi32> to vector<1x256xi32>
    %cst = arith.constant dense<0xFF800000> : vector<256xf32>
    %4 = vector.multi_reduction <maximumf>, %1, %cst [0] : vector<4x256xf32> to vector<256xf32>
    %5 = vector.shape_cast %4 : vector<256xf32> to vector<1x256xf32>
    %6 = vector.broadcast %5 : vector<1x256xf32> to vector<4x256xf32>
    %7 = arith.subf %1, %6 : vector<4x256xf32>
    %8 = math.exp %7 : vector<4x256xf32>
    %cst_5 = arith.constant dense<0.000000e+00> : vector<256xf32>
    %9 = vector.multi_reduction <add>, %8, %cst_5 [0] : vector<4x256xf32> to vector<256xf32>
    %10 = vector.shape_cast %9 : vector<256xf32> to vector<1x256xf32>
    %11 = math.log %10 : vector<1x256xf32>
    %12 = arith.addf %5, %11 : vector<1x256xf32>
    %13 = tpu.iota {dimensions = array<i32: 0>} : vector<4x256xi32>
    %14 = vector.broadcast %3 : vector<1x256xi32> to vector<4x256xi32>
    %15 = arith.cmpi eq, %13, %14 : vector<4x256xi32>
    %cst_6 = arith.constant 0.000000e+00 : f32
    %16 = vector.broadcast %cst_6 : f32 to vector<4x256xf32>
    %17 = arith.select %15, %1, %16 : vector<4x256xi1>, vector<4x256xf32>
    %cst_7 = arith.constant dense<0.000000e+00> : vector<256xf32>
    %18 = vector.multi_reduction <add>, %17, %cst_7 [0] : vector<4x256xf32> to vector<256xf32>
    %19 = vector.shape_cast %18 : vector<256xf32> to vector<1x256xf32>
    %c256_i32 = arith.constant 256 : i32
    %20 = arith.muli %arg1, %c256_i32 : i32
    %21 = tpu.iota {dimensions = array<i32: 1>} : vector<1x256xi32>
    %22 = vector.broadcast %20 : i32 to vector<1x256xi32>
    %23 = arith.addi %22, %21 : vector<1x256xi32>
    %c256_i32_8 = arith.constant 256 : i32
    %24 = vector.broadcast %c256_i32_8 : i32 to vector<1x256xi32>
    %25 = arith.cmpi slt, %23, %24 : vector<1x256xi32>
    %c255_i32 = arith.constant 255 : i32
    %26 = vector.broadcast %c255_i32 : i32 to vector<1x256xi32>
    %27 = arith.cmpi ne, %3, %26 : vector<1x256xi32>
    %28 = arith.andi %27, %25 : vector<1x256xi1>
    %29 = arith.subf %12, %19 : vector<1x256xf32>
    %cst_9 = arith.constant 0.000000e+00 : f32
    %30 = vector.broadcast %cst_9 : f32 to vector<1x256xf32>
    %31 = arith.select %28, %29, %30 : vector<1x256xi1>, vector<1x256xf32>
    %c0_10 = arith.constant 0 : index
    %c0_11 = arith.constant 0 : index
    %c0_12 = arith.constant 0 : index
    %32 = vector.load %arg4[%c0_10, %c0_11, %c0_12] : memref<1x1x256xf32, #tpu.memory_space<vmem>>, vector<1x1x256xf32>
    %33 = vector.shape_cast %32 : vector<1x1x256xf32> to vector<1x256xf32>
    %34 = vector.shape_cast %31 : vector<1x256xf32> to vector<1x1x256xf32>
    tpu.vector_store %arg4[%c0_10, %c0_11, %c0_12], %34 {strides = array<i32>} : memref<1x1x256xf32, #tpu.memory_space<vmem>>, vector<1x1x256xf32>,
    %cst_13 = arith.constant 0.356674939 : f32
    %35 = vector.broadcast %cst_13 : f32 to vector<1x256xf32>
    %36 = arith.cmpf ogt, %31, %35 : vector<1x256xf32>
    %37 = arith.andi %25, %36 : vector<1x256xi1>
    %cst_14 = arith.constant 0.000000e+00 : f32
    %38 = vector.broadcast %cst_14 : f32 to vector<1x256xf32>
    %39 = arith.select %37, %31, %38 : vector<1x256xi1>, vector<1x256xf32>
    %40 = vector.shape_cast %39 : vector<1x256xf32> to vector<1x1x256xf32>
    %cst_15 = arith.constant dense<0.000000e+00> : vector<1xf32>
    %41 = vector.multi_reduction <add>, %40, %cst_15 [1, 2] : vector<1x1x256xf32> to vector<1xf32>
    %42 = vector.shape_cast %41 : vector<1xf32> to vector<1x1x1xf32>
    %43 = vector.extract %42[0, 0, 0] : f32 from vector<1x1x1xf32>
    %44 = vector.broadcast %43 : f32 to vector<8x128xf32>
    %c0_16 = arith.constant 0 : index
    %c0_17 = arith.constant 0 : index
    %c0_18 = arith.constant 0 : index
    %c0_19 = arith.constant 0 : index
    %45 = vector.load %arg5[%c0_16, %c0_17, %c0_18, %c0_19] : memref<1x1x8x128xf32, #tpu.memory_space<vmem>>, vector<1x1x8x128xf32>
    %46 = vector.shape_cast %45 : vector<1x1x8x128xf32> to vector<8x128xf32>
    %47 = vector.shape_cast %44 : vector<8x128xf32> to vector<1x1x8x128xf32>
    tpu.vector_store %arg5[%c0_16, %c0_17, %c0_18, %c0_19], %47 {strides = array<i32>} : memref<1x1x8x128xf32, #tpu.memory_space<vmem>>, vector<1x1x8x128xf32>,
    %48 = arith.extui %37 : vector<1x256xi1> to vector<1x256xi32>
    %49 = vector.shape_cast %48 : vector<1x256xi32> to vector<1x1x256xi32>
    %cst_20 = arith.constant dense<0> : vector<1xi32>
    %50 = vector.multi_reduction <add>, %49, %cst_20 [1, 2] : vector<1x1x256xi32> to vector<1xi32>
    %51 = vector.shape_cast %50 : vector<1xi32> to vector<1x1x1xi32>
    %52 = vector.extract %51[0, 0, 0] : i32 from vector<1x1x1xi32>
    %53 = vector.broadcast %52 : i32 to vector<8x128xi32>
    %c0_21 = arith.constant 0 : index
    %c0_22 = arith.constant 0 : index
    %c0_23 = arith.constant 0 : index
    %c0_24 = arith.constant 0 : index
    %54 = vector.load %arg6[%c0_21, %c0_22, %c0_23, %c0_24] : memref<1x1x8x128xi32, #tpu.memory_space<vmem>>, vector<1x1x8x128xi32>
    %55 = vector.shape_cast %54 : vector<1x1x8x128xi32> to vector<8x128xi32>
    %56 = vector.shape_cast %53 : vector<8x128xi32> to vector<1x1x8x128xi32>
    tpu.vector_store %arg6[%c0_21, %c0_22, %c0_23, %c0_24], %56 {strides = array<i32>} : memref<1x1x8x128xi32, #tpu.memory_space<vmem>>, vector<1x1x8x128xi32>,
    return
  }
  func.func @transform_0(%arg0: i32, %arg1: i32) -> (i32, i32, i32) {
    %c0_i32 = arith.constant 0 : i32
    %c0_i32_0 = arith.constant 0 : i32
    return %arg0, %c0_i32, %arg1 : i32, i32, i32
  }
  func.func @transform_1(%arg0: i32, %arg1: i32) -> (i32, i32, i32) {
    %c0_i32 = arith.constant 0 : i32
    %c0_i32_0 = arith.constant 0 : i32
    return %arg0, %c0_i32, %arg1 : i32, i32, i32
  }
  func.func @transform_2(%arg0: i32, %arg1: i32) -> (i32, i32, i32) {
    %c0_i32 = arith.constant 0 : i32
    %c0_i32_0 = arith.constant 0 : i32
    return %arg0, %c0_i32, %arg1 : i32, i32, i32
  }
  func.func @transform_3(%arg0: i32, %arg1: i32) -> (i32, i32, i32, i32) {
    %c0_i32 = arith.constant 0 : i32
    %c0_i32_0 = arith.constant 0 : i32
    %c0_i32_1 = arith.constant 0 : i32
    return %arg0, %arg1, %c0_i32, %c0_i32_0 : i32, i32, i32, i32
  }
  func.func @transform_4(%arg0: i32, %arg1: i32) -> (i32, i32, i32, i32) {
    %c0_i32 = arith.constant 0 : i32
    %c0_i32_0 = arith.constant 0 : i32
    %c0_i32_1 = arith.constant 0 : i32
    return %arg0, %arg1, %c0_i32, %c0_i32_0 : i32, i32, i32, i32
  }
}

</mosaic_0001>

<bundles_post_ra>
// kernel: tpu_custom_call.1
= control target key start
LH: loop header
LB: loop body
LE: loop exit
PB: predicated region body
PF: predicated region fallthrough
CT: control target
= control target key end

     0   :  { %10 = vsyncpa [#allocation3], 0  ;;  %s1398_s0 = inlined_call_operand.hbm [shape: f32[2,4,256], index: 0, kind: input, shape index: {}]   ;;  %s1399_s1 = inlined_call_operand.hbm [shape: s32[2,1,256], index: 1, kind: input, shape index: {}]   ;;  %s1400_s2 = inlined_call_operand.hbm [shape: f32[2,1,256], index: 2, kind: output, shape index: {0}]   ;;  %s1401_s3 = inlined_call_operand.hbm [shape: f32[2,1,8,128], index: 3, kind: output, shape index: {1}]   ;;  %s1402_s4 = inlined_call_operand.hbm [shape: s32[2,1,8,128], index: 4, kind: output, shape index: {2}]  }
   0x1   :  { %12 = vsyncpa [#allocation3 + $0x1], 0 }
   0x2   :  { %13 = vsyncpa [#allocation6], 0 }
   0x3   :  { %15 = vsyncpa [#allocation6 + $0x1], 0 }
   0x4   :  { %16 = vsyncpa [#allocation4], 0 }
   0x5   :  { %18 = vsyncpa [#allocation4 + $0x1], 0 }
   0x6   :  { %19 = vsyncpa [#allocation9], 0 }
   0x7   :  { %21 = vsyncpa [#allocation9 + $0x1], 0  ;;  %s1088_s15 = smov 0   ;;  %s1090_s16 = smov 0  }
   0x8   :  { %s1092_s17 = smov 0   ;;  %s1094_s18 = smov 0  }
   0x9   :  { %s1096_s19 = smov 0   ;;  %s1098_s20 = smov 0  }
   0xa LB: > { %s1119_s21 = sadd.s32 4294967295, %s1053_s20   ;;  %s1404_s22 = sadd.s32 4294967294, %s1053_s20   ;;  %s1053_s20 = sphi %s1098_s20, %s27_s20   ;;  %s1049_s19 = sphi %s1096_s19, %s1424_s19   ;;  %s1045_s18 = sphi %s1094_s18, %s1423_s18   ;;  %s1041_s17 = sphi %s1092_s17, %s1422_s17   ;;  %s1037_s16 = sphi %s1090_s16, %s1421_s16   ;;  %s1033_s15 = sphi %s1088_s15, %s1420_s15  }
   0xb   : > { %s39_s23 = sadd.s32 1, %s1049_s19  ;;  %s48_s24 = sadd.s32 1, %s1041_s17 }
   0xc   : > { %p41_p0 = scmp.ge.s32.totalorder %s39_s23, 2  ;;  %p55_p1 = scmp.ne.s32.totalorder %s1041_s17, %s1037_s16 }
   0xd   : > { %p56_p2 = scmp.eq.s32.totalorder %s1053_s20, 0  ;;  %p61_p3 = scmp.ne.s32.totalorder %s1037_s16, %s1033_s15 }
   0xe   : > { %s1426_s23 = smov (%p41_p0, %s39_s23), 0  ;;  %p62_p5 = scmp.eq.s32.totalorder %s1119_s21, 0 }
   0xf   : > { %p1131_p4 = por %p56_p2, %p55_p1  ;;  %s43_s26 = ssub.s32 %s1049_s19, %s1426_s23 }
  0x10   : > { %p115_p6 = scmp.eq.s32.totalorder %s1119_s21, 1  ;;  %p46_p7 = scmp.eq.s32.totalorder %s43_s26, 0 }
  0x11   : > { %p1139_p8 = por %p62_p5, %p61_p3  ;;  %p121_p10 = scmp.eq.s32.totalorder %s1404_s22, 1 }
  0x12   : > { %p1143_p9 = por %p115_p6, %p55_p1  ;;  %p787_p13 = scmp.lt.s32.totalorder %s1053_s20, 2 }
  0x13   : > { %s1407_s27 = scalar_select %p1139_p8, 1, 0 }
  0x14   : > { %s1408_s28 = scalar_select %p1143_p9, 1, 0 }
  0x15   : > { %s1150_s29 = scalar_select %p46_p7, %s1041_s17, %s48_s24  }
  0x16   : > { %p1152_p11 = por %p121_p10, %p61_p3  ;;  %s1159_s5 = sand.u32 1, %s1041_s17  }
  0x17   : > { %s732_s6 = sshll.u32 %s1159_s5, 3  ;;  %s753_s7 = sshll.u32 %s1049_s19, 7 }
  0x18   : > { %s1409_s30 = scalar_select %p1152_p11, 1, 0 }
  0x19   : > { %s1166_s10 = scalar_lea.hbm %s1398_s0, %s753_s7  ;;  %s201_s11 = scalar_lea.vmem [#allocation2], %s732_s6 }
  0x1a   : > { %s211_s12 = sshll.u32 %s201_s11, 4  ;;  %p1172_p0 = pnand %p787_p13, %p1131_p4  ;;  %s1168_s12 = int_to_ptr.vmem [resolvable:$true] %s211_s12 }
  0x1b   : > { %s198_s14 = scalar_lea.sflag [#allocation3], %s1159_s5  ;;  %s847_s24 = scalar_lea.hbm %s1166_s10, 128 }
  0x1c   : > { %p848_p3 = scmp.ne.s32.totalorder %s1166_s10, %s847_s24  ;;  %p849_p5 = pneg %p1172_p0 }
  0x1d   : > { %s852_s25 = scalar_lea.hbm %s1398_s0, 256  ;;  %p853_p4 = scmp.lt.u32.totalorder %s1166_s10, %s1398_s0 }
  0x1e   : > { %p850_p6 = pnand %p849_p5, %p848_p3  ;;  %p854_p10 = scmp.lt.u32.totalorder %s852_s25, %s847_s24 }
  0x1f   : > { %p856_p12 = scmp.lt.u32.totalorder %s847_s24, %s1166_s10 }
  0x20   : > { %p851_p7 = pneg %p850_p6  ;;  %p855_p13 = por %p854_p10, %p853_p4 }
  0x22   : > { %p857_p1 = por %p856_p12, %p855_p13 }
  0x24   : > { %p858_p2 = pnand %p857_p1, %p851_p7 }
  0x26   : > { %861 = shalt.err (!%p858_p2)
}
  0x27   : > { %s862_s9 = scalar_lea.vmem %s1168_s12, 128  ;;  %s1055_s11 = smov [#allocation2]  }
  0x28   : > { %p863_p3 = scmp.ne.s32.totalorder %s1168_s12, %s862_s9  ;;  %s867_s26 = sshll.u32 %s1055_s11, 4  ;;  %s868_s26 = int_to_ptr.vmem [resolvable:$false] %s867_s26 }
  0x29   : > { %s869_s6 = scalar_lea.vmem %s868_s26, 256  ;;  %p870_p9 = scmp.lt.s32.totalorder %s1168_s12, %s868_s26 }
  0x2a   : > { %p865_p6 = pnand %p863_p3, %p849_p5  ;;  %p871_p4 = scmp.lt.s32.totalorder %s869_s6, %s862_s9 }
  0x2c   : > { %p866_p11 = pneg %p865_p6  ;;  %p872_p10 = por %p871_p4, %p870_p9 }
  0x2e   : > { %p873_p12 = pnand %p872_p10, %p866_p11 }
  0x30   : > { %876 = shalt.err (!%p873_p12)
}
  0x31   : > { %773 = dma.hbm_to_vmem [thread:$0]  (!%p1172_p0), %s1166_s10, 128, %s1168_s12, %s198_s14  }
  0x32   : > { %p1411_p1 = scmp.lt.s32.totalorder %s1053_s20, 3  ;;  %p1412_p2 = scmp.ge.s32.totalorder %s1053_s20, 1 }
  0x33   : > { %s735_s25 = sshll.u32 %s1159_s5, 1  ;;  %s754_s7 = sshll.u32 %s1049_s19, 5 }
  0x34   : > { %p1208_p7 = pnand %p1412_p2, %p1411_p1  ;;  %s1217_s11 = scalar_lea.hbm %s1399_s1, %s754_s7 }
  0x35   : > { %s222_s26 = scalar_lea.vmem [#allocation5], %s735_s25  ;;  %s219_s10 = scalar_lea.sflag [#allocation6], %s1159_s5 }
  0x36   : > { %s1413_s24 = scalar_select %p1208_p7, 1, 0 }
  0x37   : > { %s232_s6 = sshll.u32 %s222_s26, 4  ;;  %s877_s12 = scalar_lea.hbm %s1217_s11, 32  ;;  %s233_s6 = int_to_ptr.vmem [resolvable:$true] %s232_s6 }
  0x38   : > { %p878_p9 = scmp.ne.s32.totalorder %s1217_s11, %s877_s12  ;;  %s882_s8 = scalar_lea.hbm %s1399_s1, 64 }
  0x39   : > { %p883_p3 = scmp.lt.u32.totalorder %s1217_s11, %s1399_s1  ;;  %p884_p6 = scmp.lt.u32.totalorder %s882_s8, %s877_s12 }
  0x3a   : > { %p880_p11 = pnand %p878_p9, %p849_p5  ;;  %p886_p10 = scmp.lt.u32.totalorder %s877_s12, %s1217_s11 }
  0x3b   : > { %p885_p4 = por %p884_p6, %p883_p3 }
  0x3c   : > { %p881_p13 = pneg %p880_p11 }
  0x3d   : > { %p887_p12 = por %p886_p10, %p885_p4 }
  0x3f   : > { %p888_p1 = pnand %p887_p12, %p881_p13 }
  0x41   : > { %891 = shalt.err (!%p888_p1)
}
  0x42   : > { %s892_s5 = scalar_lea.vmem %s233_s6, 32  ;;  %s1056_s25 = smov [#allocation5]  }
  0x43   : > { %p893_p2 = scmp.ne.s32.totalorder %s233_s6, %s892_s5  ;;  %s897_s22 = sshll.u32 %s1056_s25, 4  ;;  %s898_s22 = int_to_ptr.vmem [resolvable:$false] %s897_s22 }
  0x44   : > { %s899_s26 = scalar_lea.vmem %s898_s22, 64  ;;  %p900_p8 = scmp.lt.s32.totalorder %s233_s6, %s898_s22 }
  0x45   : > { %p895_p9 = pnand %p893_p2, %p849_p5  ;;  %p901_p7 = scmp.lt.s32.totalorder %s899_s26, %s892_s5 }
  0x47   : > { %p896_p11 = pneg %p895_p9  ;;  %p902_p3 = por %p901_p7, %p900_p8 }
  0x49   : > { %p903_p6 = pnand %p902_p3, %p896_p11 }
  0x4b   : > { %906 = shalt.err (!%p903_p6)
}
  0x4c   : > { %776 = dma.hbm_to_vmem [thread:$0]  (!%p1172_p0), %s1217_s11, 32, %s233_s6, %s219_s10  }
  0x4d   : > { %p1414_p13 = scmp.ne.s32.totalorder %s1413_s24, 0 }
  0x4e   : > { %s1242_s12 = sand.u32 (!%p1414_p13), 1, %s1037_s16   ;;  %p1415_p8 = scmp.ne.s32.totalorder (!%p1414_p13), %s1407_s27, 0 }
  0x4f   : > { %241 = sbr.rel (%p1414_p13) target bundleno = 414 (0x19e), region = 28  ;;  %s1245_s14 = sshll.u32 (!%p1414_p13), %s1242_s12, 3 }
  0x50   : > { %s244_s8 = scalar_lea.sflag (!%p1414_p13), [#allocation3], %s1242_s12  ;;  %s247_s7 = scalar_lea.vmem (!%p1414_p13), [#allocation2], %s1245_s14 }
  0x56   : > { %1016 = dma.done.wait (%p1415_p8), %s244_s8, 128  }
  0x57   : > { %1018 = vsyncadd (%p1415_p8), %s244_s8, 4294967168  ;;  %s740_s13 = sshll.u32 %s1242_s12, 1  ;;  %s253_s24 = scalar_lea.sflag [#allocation6], %s1242_s12 }
  0x58   : > { %s256_s11 = scalar_lea.vmem [#allocation5], %s740_s13 }
  0x59   : > { %1020 = dma.done.wait (%p1415_p8), %s253_s24, 32  }
  0x5a   : > { %1022 = vsyncadd (%p1415_p8), %s253_s24, 4294967264  ;;  %vm304_vm0 = vcmask 1043456   ;;  %v299_v0 = vld [vmem:[%s247_s7] sm:$0xff]  ;;  %v349_v15 = vlaneseq  ;;  %v300_v22 = vld [vmem:[%s256_s11] sm:$0x3]  ;;  %v1058_v58 = vmov 1  }
  0x5b   : > { %v302_v1 = vcombine.high %v299_v0, %v299_v0  ;;  %v305_v2 = vsel %vm304_vm0, %v299_v0, -inf  ;;  %v1057_v50 = vmov 1966171168   ;;  %v389_v59 = vcombine.low %v1058_v58, %v1058_v58  ;;  %s281_s27 = scalar_lea.vmem [#allocation7], %s740_s13  ;;  %s755_s6 = sshll.u32 %s1045_s18, 5 }
  0x5c   : > { %v306_v3 = vrot.slane %v305_v2, 4  ;;  %v350_v18 = vshrl.u32 %v349_v15, 7  ;;  %v391_v51 = vunpack.c.l.s4 %v1057_v50  ;;  %vm386_vm3 = vcmp.ne.s32.totalorder %v300_v22, 255  ;;  %s1285_s5 = scalar_lea.hbm %s1400_s2, %s755_s6  ;;  %s527_s25 = sshll.u32 %s281_s27, 4  ;;  %s528_s25 = int_to_ptr.vmem [resolvable:$true] %s527_s25 }
  0x5d   : > { %v312_v4 = vsel %vm304_vm0, %v302_v1, -inf  ;;  %vm459_vm7 = vcmask 1040384   ;;  %vm429_vm10 = vcmp.lt.s32.totalorder %v349_v15, 256  ;;  %s501_s22 = scalar_lea.sflag [#allocation4], %s1242_s12  ;;  %s907_s26 = scalar_lea.vmem %s528_s25, 32 }
  0x5e   : > { %v307_v5 = vmax.f32 %v305_v2, %v306_v3  ;;  %v313_v6 = vrot.slane %v312_v4, 4  ;;  %v1264_v21 = vsub.s32 0, %v350_v18  ;;  %v1266_v23 = vsub.s32 1, %v350_v18  ;;  %p908_p0 = scmp.ne.s32.totalorder %s528_s25, %s907_s26  ;;  %p1416_p5 = scmp.ne.s32.totalorder %s1408_s28, 0 }
  0x5f   : > { %v392_v55 = vunpack.c.0.s8 %v391_v51  ;;  %s1060_s8 = smov [#allocation7]  }
  0x60   : > { %v308_v7 = vrot.slane %v307_v5, 2  ;;  %v314_v8 = vmax.f32 %v312_v4, %v313_v6  ;;  %v354_v24 = vrot.slane %v300_v22, %v1264_v21  ;;  %v358_v25 = vrot.slane %v300_v22, %v1266_v23  ;;  %p909_p7 = pnand %p908_p0, %p1416_p5  ;;  %s911_s7 = sshll.u32 %s1060_s8, 4  ;;  %s912_s7 = int_to_ptr.vmem [resolvable:$false] %s911_s7 }
  0x61   : > { %v395_v60 = vsub.s32 %v392_v55, %v350_v18  ;;  %s913_s24 = scalar_lea.vmem %s912_s7, 64  ;;  %p914_p10 = scmp.lt.s32.totalorder %s528_s25, %s912_s7 }
  0x62   : > { %v309_v9 = vmax.f32 %v307_v5, %v308_v7  ;;  %v315_v10 = vrot.slane %v314_v8, 2  ;;  %vm359_vm1 = vcmp.eq.s32.totalorder %v350_v18, %v354_v24  ;;  %vm360_vm2 = vcmp.eq.s32.totalorder %v350_v18, %v358_v25  ;;  %p910_p4 = pneg %p909_p7  ;;  %p915_p12 = scmp.lt.s32.totalorder %s913_s24, %s907_s26 }
  0x63   : > { %v361_v26 = vsel %vm359_vm1, %v299_v0, 0.0  ;;  %v362_v30 = vsel %vm360_vm2, %v302_v1, 0.0  ;;  %v396_v1 = vrot.slane %v389_v59, %v395_v60 }
  0x64   : > { %v310_v11 = vrot.slane %v309_v9, 1  ;;  %v316_v12 = vmax.f32 %v314_v8, %v315_v10  ;;  %v363_v32 = vsel %vm304_vm0, %v361_v26, 0.0  ;;  %v370_v36 = vsel %vm304_vm0, %v362_v30, 0.0  ;;  %p916_p1 = por %p915_p12, %p914_p10 }
  0x65   : > { %v364_v37 = vrot.slane %v363_v32, 4  ;;  %v371_v40 = vrot.slane %v370_v36, 4  ;;  %v403_v7 = vrot.slane %v396_v1, %v395_v60 }
  0x66   : > { %v311_v13 = vmax.f32 %v309_v9, %v310_v11  ;;  %v317_v14 = vrot.slane %v316_v12, 1  ;;  %p917_p2 = pnand %p916_p1, %p910_p4 }
  0x67   : > { %v365_v43 = vadd.f32 %v364_v37, %v363_v32  ;;  %v372_v46 = vadd.f32 %v371_v40, %v370_v36  ;;  %vm404_vm4 = vcmp.ne.s32.totalorder %v403_v7, 0 }
  0x68   : > { %v318_v16 = vmax.f32 %v316_v12, %v317_v14  ;;  %vm405_vm5 = vmand %vm386_vm3, %vm404_vm4 }
  0x69   : > { %v366_v49 = vrot.slane %v365_v43, 2  ;;  %v373_v53 = vrot.slane %v372_v46, 2 }
  0x6a   : > { %v321_v17 = vcombine.low %v311_v13, %v318_v16 }
  0x6b   : > { %v367_v54 = vadd.f32 %v366_v49, %v365_v43  ;;  %v374_v56 = vadd.f32 %v373_v53, %v372_v46 }
  0x6c   : > { %v323_v19 = vsub.f32 %v299_v0, %v321_v17  ;;  %v1059_v17 = vmov 0  }
  0x6d   : > { %v368_v57 = vrot.slane %v367_v54, 1  ;;  %v375_v61 = vrot.slane %v374_v56, 1 }
  0x6e   : > { %v324_v20 = vmul.f32 1.442695, %v323_v19 }
  0x6f   : > { %v369_v0 = vadd.f32 %v368_v57, %v367_v54  ;;  %v376_v5 = vadd.f32 %v375_v61, %v374_v56 }
  0x70   : > { %841 = vpow2.f32 %v324_v20 }
  0x7a   : > { %v842_v27 = vpop.eup %841 }
  0x7b   : > { %v327_v28 = vcombine.high %v842_v27, %v842_v27  ;;  %v329_v29 = vsel %vm304_vm0, %v842_v27, 0.0 }
  0x7c   : > { %v330_v31 = vrot.slane %v329_v29, 4 }
  0x7d   : > { %v336_v33 = vsel %vm304_vm0, %v327_v28, 0.0 }
  0x7e   : > { %v331_v34 = vadd.f32 %v330_v31, %v329_v29  ;;  %v337_v35 = vrot.slane %v336_v33, 4 }
  0x80   : > { %v332_v38 = vrot.slane %v331_v34, 2  ;;  %v338_v39 = vadd.f32 %v337_v35, %v336_v33 }
  0x82   : > { %v333_v41 = vadd.f32 %v332_v38, %v331_v34  ;;  %v339_v42 = vrot.slane %v338_v39, 2 }
  0x84   : > { %v334_v44 = vrot.slane %v333_v41, 1  ;;  %v340_v45 = vadd.f32 %v339_v42, %v338_v39 }
  0x86   : > { %v335_v47 = vadd.f32 %v334_v44, %v333_v41  ;;  %v341_v48 = vrot.slane %v340_v45, 1 }
  0x88   : > { %v342_v52 = vadd.f32 %v341_v48, %v340_v45  ;;  %843 = vlog2.f32 %v335_v47 }
  0x8a   : > { %845 = vlog2.f32 %v342_v52 }
  0x92   : > { %v844_v62 = vpop.eup %843 }
  0x93   : > { %v344_v63 = vmul.f32 0.6931472, %v844_v62 }
  0x94   : > { %v846_v2 = vpop.eup %845 }
  0x95   : > { %v346_v3 = vmul.f32 0.6931472, %v846_v2  ;;  %v347_v4 = vadd.f32 %v344_v63, %v311_v13 }
  0x97   : > { %v348_v6 = vadd.f32 %v346_v3, %v318_v16  ;;  %v406_v8 = vsub.f32 %v347_v4, %v369_v0 }
  0x99   : > { %v407_v9 = vsub.f32 %v348_v6, %v376_v5 }
  0x9b   : > { %v410_v10 = vcombine.low %v406_v8, %v407_v9 }
  0x9d   : > { %v417_v11 = vrot.slane %v410_v10, %v395_v60 }
  0x9f   : > { %v424_v12 = vrot.slane %v417_v11, %v395_v60 }
  0xa1   : > { %v426_v14 = vsel %vm405_vm5, %v424_v12, 0.0 }
  0xa2   : > { %vm432_vm6 = vcmp.gt.f32.partialorder %v426_v14, 0.35667494  ;;  %v450_v19 = vrot.slane %v426_v14, %v1264_v21  ;;  %v454_v20 = vrot.slane %v426_v14, %v1266_v23  ;;  %431 = vst.msk [vmem:[%s281_s27] sm:$0x3] %vm429_vm10, %v426_v14 }
  0xa3   : > { %v433_v18 = vsel %vm432_vm6, 1, %v1059_v17 }
  0xa4   : > { %v437_v13 = vrot.slane %v433_v18, %v1264_v21  ;;  %v441_v16 = vrot.slane %v433_v18, %v1266_v23 }
  0xa6   : > { %vm442_vm8 = vcmp.ne.s32.totalorder %v437_v13, 0  ;;  %vm443_vm9 = vcmp.ne.s32.totalorder %v441_v16, 0 }
  0xa7   : > { %v474_v22 = vsel %vm442_vm8, 1, %v1059_v17  ;;  %v475_v24 = vsel %vm443_vm9, 1, %v1059_v17  ;;  %v457_v25 = vsel %vm442_vm8, %v450_v19, 0.0  ;;  %v458_v26 = vsel %vm443_vm9, %v454_v20, 0.0 }
  0xa8   : > { %v476_v27 = vsel %vm459_vm7, %v474_v22, 0  ;;  %v477_v28 = vsel %vm459_vm7, %v475_v24, 0  ;;  %v460_v29 = vsel %vm459_vm7, %v457_v25, 0.0  ;;  %v461_v30 = vsel %vm459_vm7, %v458_v26, 0.0 }
  0xa9   : > { %v478_v31 = vadd.s32 %v477_v28, %v476_v27  ;;  %v462_v32 = vadd.f32 %v461_v30, %v460_v29 }
  0xab   : > { %v480_v33 = vshrl.u32 %v478_v31, 16  ;;  %463 = vadd.xlane.f32.xlu1 %v462_v32  ;;  %v479_v21 = vand.u32 65535, %v478_v31 }
  0xad   : > { %v482_v23 = vcvt.s32.f32 %v480_v33  ;;  %v481_v34 = vcvt.s32.f32 %v479_v21 }
  0xaf   : > { %485 = vadd.xlane.f32.xlu0 %v482_v23 }
  0xb3   : > { %483 = vadd.xlane.f32.xlu0 %v481_v34 }
  0xb4   : > { %920 = shalt.err (!%p917_p2)
}
  0xb5   : > { %s921_s12 = scalar_lea.hbm %s1285_s5, 32  ;;  %s925_s27 = scalar_lea.hbm %s1400_s2, 64 }
  0xb6   : > { %p922_p9 = scmp.ne.s32.totalorder %s1285_s5, %s921_s12  ;;  %p926_p6 = scmp.lt.u32.totalorder %s1285_s5, %s1400_s2 }
  0xb7   : > { %p927_p13 = scmp.lt.u32.totalorder %s925_s27, %s921_s12  ;;  %p929_p0 = scmp.lt.u32.totalorder %s921_s12, %s1285_s5 }
  0xb8   : > { %p923_p11 = pnand %p922_p9, %p1416_p5 }
  0xb9   : > { %p928_p8 = por %p927_p13, %p926_p6 }
  0xba   : > { %p924_p3 = pneg %p923_p11 }
  0xbb   : > { %p930_p7 = por %p929_p0, %p928_p8 }
  0xbd   : > { %p931_p4 = pnand %p930_p7, %p924_p3 }
  0xbf   : > { %934 = shalt.err (!%p931_p4)
}
  0xc0   : > { %764 = dma.vmem_to_hbm [thread:$0]  (%p1416_p5), %s528_s25, 32, %s1285_s5, %s501_s22  }
  0xc1   : > { %s505_s9 = sand.u32 1, %s1119_s21   ;;  %s749_s5 = sshll.u32 %s1045_s18, 7 }
  0xc2   : > { %s288_s25 = scalar_lea.vmem [#allocation8], %s1245_s14  ;;  %s1313_s7 = scalar_lea.hbm %s1401_s3, %s749_s5 }
  0xc3   : > { %s541_s22 = sshll.u32 %s288_s25, 4  ;;  %s1317_s12 = scalar_lea.sflag [#allocation9], %s505_s9  ;;  %s1315_s22 = int_to_ptr.vmem [resolvable:$true] %s541_s22 }
  0xc4   : > { %s935_s21 = scalar_lea.vmem %s1315_s22, 128  ;;  %s1061_s13 = smov [#allocation8]  }
  0xc5   : > { %p936_p10 = scmp.ne.s32.totalorder %s1315_s22, %s935_s21  ;;  %s939_s11 = sshll.u32 %s1061_s13, 4  ;;  %s940_s11 = int_to_ptr.vmem [resolvable:$false] %s939_s11 }
  0xc6   : > { %s941_s27 = scalar_lea.vmem %s940_s11, 256  ;;  %p942_p2 = scmp.lt.s32.totalorder %s1315_s22, %s940_s11 }
  0xc7   : > { %p937_p12 = pnand %p936_p10, %p1416_p5  ;;  %p943_p9 = scmp.lt.s32.totalorder %s941_s27, %s935_s21 }
  0xc9   : > { %p938_p1 = pneg %p937_p12  ;;  %p944_p11 = por %p943_p9, %p942_p2 }
  0xcb   : > { %p945_p3 = pnand %p944_p11, %p938_p1 }
 0x138   : > { %v464_v15 = vpop.xlane.xlu1 %463 }
 0x139   : > { %v465_v35 = vrot.slane %v464_v15, 4 }
 0x13b   : > { %v466_v36 = vadd.f32 %v465_v35, %v464_v15 }
 0x13c   : > { %v486_v37 = vpop.xlane.xlu0 %485 }
 0x13d   : > { %v488_v38 = vcvt.f32.s32 %v486_v37  ;;  %v467_v39 = vrot.slane %v466_v36, 2 }
 0x13f   : > { %v468_v40 = vadd.f32 %v467_v39, %v466_v36  ;;  %v489_v42 = vshll.u32 %v488_v38, 16 }
 0x140   : > { %v484_v41 = vpop.xlane.xlu0 %483 }
 0x141   : > { %v487_v43 = vcvt.f32.s32 %v484_v41  ;;  %v469_v44 = vrot.slane %v468_v40, 1 }
 0x143   : > { %v490_v45 = vadd.s32 %v489_v42, %v487_v43  ;;  %v470_v46 = vadd.f32 %v469_v44, %v468_v40 }
 0x145   : > { %v491_v47 = vrot.slane %v490_v45, 4  ;;  %756 = vpush %v470_v46 }
 0x147   : > { %v492_v48 = vadd.s32 %v491_v47, %v490_v45 }
 0x149   : > { %v493_v49 = vrot.slane %v492_v48, 2 }
 0x14b   : > { %v494_v50 = vadd.s32 %v493_v49, %v492_v48 }
 0x14d   : > { %v495_v51 = vrot.slane %v494_v50, 1 }
 0x14f   : > { %v496_v52 = vadd.s32 %v495_v51, %v494_v50 }
 0x151   : > { %758 = vpush %v496_v52 }
 0x176   : > { %s757_s24 = spop %756 }
 0x177   : > { %v472_v53 = vstv %s757_s24 }
 0x178   : > { %473 = vst [vmem:[%s288_s25] sm:$0xff] %v472_v53 }
 0x179   : > { %948 = shalt.err (!%p945_p3)
}
 0x17a   : > { %s949_s6 = scalar_lea.hbm %s1313_s7, 128  ;;  %s953_s25 = scalar_lea.hbm %s1401_s3, 256 }
 0x17b   : > { %p950_p6 = scmp.ne.s32.totalorder %s1313_s7, %s949_s6  ;;  %p954_p0 = scmp.lt.u32.totalorder %s1313_s7, %s1401_s3 }
 0x17c   : > { %p955_p7 = scmp.lt.u32.totalorder %s953_s25, %s949_s6  ;;  %p957_p10 = scmp.lt.u32.totalorder %s949_s6, %s1313_s7 }
 0x17d   : > { %p951_p13 = pnand %p950_p6, %p1416_p5 }
 0x17e   : > { %p956_p4 = por %p955_p7, %p954_p0 }
 0x17f   : > { %p952_p8 = pneg %p951_p13 }
 0x180   : > { %p958_p12 = por %p957_p10, %p956_p4 }
 0x182   : > { %p959_p1 = pnand %p958_p12, %p952_p8 }
 0x184   : > { %962 = shalt.err (!%p959_p1)
}
 0x185   : > { %765 = dma.vmem_to_hbm [thread:$0]  (%p1416_p5), %s1315_s22, 128, %s1313_s7, %s1317_s12  }
 0x186   : > { %s295_s24 = scalar_lea.vmem [#allocation10], %s1245_s14  ;;  %s759_s13 = spop %758 }
 0x187   : > { %s555_s21 = sshll.u32 %s295_s24, 4  ;;  %s1349_s6 = scalar_lea.hbm %s1402_s4, %s749_s5  ;;  %v498_v54 = vstv %s759_s13  ;;  %s1342_s21 = int_to_ptr.vmem [resolvable:$true] %s555_s21 }
 0x188   : > { %499 = vst [vmem:[%s295_s24] sm:$0xff] %v498_v54  ;;  %s963_s10 = scalar_lea.vmem %s1342_s21, 128  ;;  %s1062_s14 = smov [#allocation10]  }
 0x189   : > { %p964_p2 = scmp.ne.s32.totalorder %s1342_s21, %s963_s10  ;;  %s967_s22 = sshll.u32 %s1062_s14, 4  ;;  %s968_s22 = int_to_ptr.vmem [resolvable:$false] %s967_s22 }
 0x18a   : > { %s969_s7 = scalar_lea.vmem %s968_s22, 256  ;;  %p970_p3 = scmp.lt.s32.totalorder %s1342_s21, %s968_s22 }
 0x18b   : > { %p965_p9 = pnand %p964_p2, %p1416_p5  ;;  %p971_p6 = scmp.lt.s32.totalorder %s969_s7, %s963_s10 }
 0x18d   : > { %p966_p11 = pneg %p965_p9  ;;  %p972_p13 = por %p971_p6, %p970_p3 }
 0x18f   : > { %p973_p8 = pnand %p972_p13, %p966_p11 }
 0x191   : > { %976 = shalt.err (!%p973_p8)
}
 0x192   : > { %s977_s18 = scalar_lea.hbm %s1349_s6, 128  ;;  %s981_s25 = scalar_lea.hbm %s1402_s4, 256 }
 0x193   : > { %p978_p0 = scmp.ne.s32.totalorder %s1349_s6, %s977_s18  ;;  %p982_p10 = scmp.lt.u32.totalorder %s1349_s6, %s1402_s4 }
 0x194   : > { %p983_p12 = scmp.lt.u32.totalorder %s981_s25, %s977_s18  ;;  %p985_p2 = scmp.lt.u32.totalorder %s977_s18, %s1349_s6 }
 0x195   : > { %p979_p7 = pnand %p978_p0, %p1416_p5 }
 0x196   : > { %p984_p1 = por %p983_p12, %p982_p10 }
 0x197   : > { %p980_p4 = pneg %p979_p7 }
 0x198   : > { %p986_p9 = por %p985_p2, %p984_p1 }
 0x19a   : > { %p987_p11 = pnand %p986_p9, %p980_p4 }
 0x19c   : > { %990 = shalt.err (!%p987_p11)
}
 0x19d   : > { %766 = dma.vmem_to_hbm [thread:$0]  (%p1416_p5), %s1342_s21, 128, %s1349_s6, %s1317_s12  }
 0x19e PF: > { %s567_s24 = sand.u32 1, %s1033_s15   ;;  %p1417_p3 = scmp.ne.s32.totalorder %s1409_s30, 0 }
 0x19f   : > { %p1418_p6 = scmp.ge.s32.totalorder %s1053_s20, 2  ;;  %s568_s13 = scalar_lea.sflag [#allocation4], %s567_s24 }
 0x1a1   : > { %p778_p13 = pnand %p1418_p6, %p1417_p3 }
 0x1a3   : > { %1024 = dma.done.wait (!%p778_p13), %s568_s13, 32  }
 0x1a4   : > { %1026 = vsyncadd (!%p778_p13), %s568_s13, 4294967264  ;;  %s1419_s11 = sadd.s32 4294967294, %s1053_s20  }
 0x1a5   : > { %s576_s27 = sand.u32 1, %s1419_s11  }
 0x1a6   : > { %s577_s10 = scalar_lea.sflag [#allocation9], %s576_s27 }
 0x1a7   : > { %1028 = dma.done.wait (!%p778_p13), %s577_s10, 256  }
 0x1a8   : > { %1030 = vsyncadd (!%p778_p13), %s577_s10, 4294967040  ;;  %s27_s20 = sadd.s32 1, %s1053_s20   ;;  %s1420_s15 = smov %s1037_s16 }
 0x1a9   : > { %p24_p5 = scmp.ge.s32.totalorder %s27_s20, 4   ;;  %s1421_s16 = smov %s1041_s17 }
 0x1aa   : > { %s1422_s17 = smov %s1150_s29  ;;  %s1423_s18 = smov %s1049_s19 }
 0x1ab   : > { %s1424_s19 = smov %s1426_s23  ;;  %26 = sbr.rel (!%p24_p5) target bundleno = 10 (0xa), region = 118 }
 0x1b2   :  { %591 = vsyncpa [#allocation3], 1 }
 0x1b3   :  { %593 = vsyncpa [#allocation3 + $0x1], 1 }
 0x1b4   :  { %594 = vsyncpa [#allocation6], 1 }
 0x1b5   :  { %596 = vsyncpa [#allocation6 + $0x1], 1 }
 0x1b6   :  { %597 = vsyncpa [#allocation4], 1 }
 0x1b7   :  { %599 = vsyncpa [#allocation4 + $0x1], 1 }
 0x1b8   :  { %600 = vsyncpa [#allocation9], 1 }
 0x1b9   :  { %602 = vsyncpa [#allocation9 + $0x1], 1 }

</bundles_post_ra>
